<compile_context>
chip_gen: v7x
topology: tpu7x:2x2x1
jax: 0.10.0
libtpu: 0.0.40
codegen_flags: <defaults>
</compile_context>

<pallas_src>
import functools

import jax
import jax.numpy as jnp
from jax.experimental import pallas as pl
from jax.experimental.pallas import tpu as pltpu


def _cln_kernel(x_ref, gain_ref, bias_ref, o_ref, carry_ref, cum_ref, *,
                eps: float, channels: int, tile_t: int, chunk: int):
    t = pl.program_id(1)

    # Reset the carried cumulative sums at the start of every batch element.
    @pl.when(t == 0)
    def _():
        carry_ref[...] = jnp.zeros_like(carry_ref)

    x = x_ref[...].astype(jnp.float32)                        # (1, C, Tt)

    # Per-time-step channel (sublane) reductions, stacked so one matmul per
    # chunk handles both cumulative sums: row 0 = sum_c x, row 1 = sum_c x^2.
    step = jnp.concatenate(
        [jnp.sum(x, axis=1), jnp.sum(x * x, axis=1)], axis=0)  # (2, Tt)

    # Small fixed upper-triangular ones matrix (chunk x chunk), built from
    # iotas in-kernel: tri[s, u] = 1 if s <= u  ->  inclusive prefix sum.
    row = jax.lax.broadcasted_iota(jnp.int32, (chunk, chunk), 0)
    col = jax.lax.broadcasted_iota(jnp.int32, (chunk, chunk), 1)
    tri = (row <= col).astype(jnp.float32)

    # Chunked inclusive prefix over time.  Each chunk is one tiny MXU matmul
    # at HIGHEST precision (f32-accurate); chunk totals + the inter-block
    # carry are chained with exact f32 adds.
    nchunk = tile_t // chunk
    carry = carry_ref[...]                                    # (2, 1)
    for c in range(nchunk):
        sc = step[:, c * chunk:(c + 1) * chunk]               # (2, chunk)
        pref = jnp.dot(sc, tri,
                       precision=jax.lax.Precision.HIGHEST,
                       preferred_element_type=jnp.float32)
        pref = pref + carry                                   # lane broadcast
        cum_ref[:, c * chunk:(c + 1) * chunk] = pref
        carry = pref[:, chunk - 1:chunk]                      # running totals
    carry_ref[...] = carry

    cum = cum_ref[...]                                        # (2, Tt)

    # entry_cnt[t] = (global_t + 1) * C
    pos = (jax.lax.broadcasted_iota(jnp.int32, (1, tile_t), 1)
           + t * tile_t + 1)
    entry_cnt = pos.astype(jnp.float32) * float(channels)     # (1, Tt)

    cm = cum / entry_cnt                                      # (2, Tt), tiny
    cum_mean = cm[0:1, :]
    cum_pow_mean = cm[1:2, :]
    # Clamp variance at 0 to avoid NaNs from f32 rounding (reference formula
    # is the same catastrophic-cancellation form, so parity holds).
    cum_var = jnp.maximum(cum_pow_mean - cum_mean * cum_mean, 0.0)
    inv_std = jax.lax.rsqrt(cum_var + eps)                    # EUP, no divide

    gain = gain_ref[...].astype(jnp.float32)                  # (1, C, 1)
    bias = bias_ref[...].astype(jnp.float32)
    out = (x - cum_mean[:, None, :]) * inv_std[:, None, :] * gain + bias
    o_ref[...] = out.astype(o_ref.dtype)


def cln(x, gain, bias, eps=1e-8, block_t=1024,
        vmem_budget_bytes=12 * 1024 * 1024):
    """cLN forward.  x: (B, C, T); gain/bias: (1, C, 1). Output dtype = x dtype."""
    B, C, T = x.shape
    dsize = jnp.dtype(x.dtype).itemsize

    # Cap the time tile so x + out double buffers (4 * C * tile_t * dsize
    # bytes) stay within the VMEM budget (v5e default scoped VMEM = 16 MiB).
    cap = max(128, (vmem_budget_bytes // (4 * C * dsize)) // 128 * 128)
    eff_block = max(128, (min(block_t, cap) // 128) * 128)

    if T <= 128:
        tile_t = T                       # single lane block == full time axis
        n_blocks = 1
        chunk = T
    else:
        n_blocks = -(-T // eff_block)                      # ceil
        tile_t = 128 * (-(-T // (128 * n_blocks)))         # equal-ish tiles,
        chunk = 128                                        # padding < 128/blk
    t_pad = tile_t * n_blocks

    x_p = x if t_pad == T else jnp.pad(x, ((0, 0), (0, 0), (0, t_pad - T)))

    kernel = functools.partial(_cln_kernel, eps=float(eps), channels=C,
                               tile_t=tile_t, chunk=chunk)

    out = pl.pallas_call(
        kernel,
        out_shape=jax.ShapeDtypeStruct((B, C, t_pad), x.dtype),
        grid_spec=pltpu.PrefetchScalarGridSpec(
            num_scalar_prefetch=0,
            grid=(B, n_blocks),
            in_specs=[
                pl.BlockSpec((1, C, tile_t), lambda b, t: (b, 0, t)),  # x
                pl.BlockSpec((1, C, 1), lambda b, t: (0, 0, 0)),       # gain
                pl.BlockSpec((1, C, 1), lambda b, t: (0, 0, 0)),       # bias
            ],
            out_specs=pl.BlockSpec((1, C, tile_t), lambda b, t: (b, 0, t)),
            scratch_shapes=[
                pltpu.VMEM((2, 1), jnp.float32),        # inter-block carry
                pltpu.VMEM((2, tile_t), jnp.float32),   # intra-block cumsum
            ],
        ),
        compiler_params=pltpu.CompilerParams(
            dimension_semantics=("parallel", "arbitrary")),
    )(x_p, gain, bias)

    return out if t_pad == T else out[:, :, :T]


def cln_reference(x, gain, bias, eps=1e-8):
    """Pure-JAX reference mirroring the PyTorch forward exactly."""
    B, C, T = x.shape
    xf = x.astype(jnp.float32)
    step_sum = xf.sum(axis=1)                      # (B, T)
    step_pow_sum = (xf * xf).sum(axis=1)           # (B, T)
    cum_sum = jnp.cumsum(step_sum, axis=1)
    cum_pow_sum = jnp.cumsum(step_pow_sum, axis=1)
    entry_cnt = jnp.arange(1, T + 1, dtype=jnp.float32).reshape(1, -1) * C
    cum_mean = cum_sum / entry_cnt
    cum_var = cum_pow_sum / entry_cnt - cum_mean ** 2
    cum_std = jnp.sqrt(cum_var + eps)
    xn = (xf - cum_mean[:, None, :]) / cum_std[:, None, :]
    return xn * gain + bias


if __name__ == "__main__":
    # Module __init__: dimension = C; gain = ones(1, C, 1), bias = zeros(1, C, 1).
    B, C, T = 2, 4, 16
    eps = 1e-8

    key = jax.random.PRNGKey(0)
    k0, k1 = jax.random.split(key)
    x = jax.random.normal(k0, (B, C, T), dtype=jnp.float32)
    gain = jnp.ones((1, C, 1), dtype=jnp.float32)
    bias = jnp.zeros((1, C, 1), dtype=jnp.float32)

    out = jax.block_until_ready(cln(x, gain, bias, eps=eps))
    ref = cln_reference(x, gain, bias, eps=eps)
    assert out.shape == (B, C, T)
    assert jnp.allclose(out, ref, atol=1e-5, rtol=1e-5), "mismatch vs reference"

    # Multi-T-block path: exercises the chunked prefix (nchunk=2), the
    # inter-block carry, and tail padding (T=300 -> two 256-wide tiles).
    T2 = 300
    x2 = jax.random.normal(k1, (B, C, T2), dtype=jnp.float32)
    out2 = jax.block_until_ready(cln(x2, gain, bias, eps=eps, block_t=256))
    ref2 = cln_reference(x2, gain, bias, eps=eps)
    assert out2.shape == (B, C, T2)
    assert jnp.allclose(out2, ref2, atol=1e-4, rtol=1e-4), "mismatch (tiled T)"

    # bf16 I/O path (stats stay f32 inside the kernel).
    x3 = x2.astype(jnp.bfloat16)
    out3 = jax.block_until_ready(cln(x3, gain, bias, eps=eps, block_t=256))
    ref3 = cln_reference(x3.astype(jnp.float32), gain, bias, eps=eps)
    assert out3.shape == (B, C, T2) and out3.dtype == jnp.bfloat16
    assert jnp.allclose(out3.astype(jnp.float32), ref3, atol=5e-2, rtol=5e-2), \
        "mismatch (bf16 I/O)"

    print("KERNEL_OK")
</pallas_src>

<mosaic_0001>
module attributes {stable_mosaic.version = 11 : i64} {
  func.func @_cln_kernel(%arg0: i32, %arg1: i32, %arg2: memref<1x4x16xf32, #tpu.memory_space<vmem>>, %arg3: memref<1x4x1xf32, #tpu.memory_space<vmem>>, %arg4: memref<1x4x1xf32, #tpu.memory_space<vmem>>, %arg5: memref<1x4x16xf32, #tpu.memory_space<vmem>>, %arg6: memref<2x1xf32, #tpu.memory_space<vmem>>, %arg7: memref<2x16xf32, #tpu.memory_space<vmem>>) attributes {dimension_semantics = [#tpu.dimension_semantics<parallel>, #tpu.dimension_semantics<arbitrary>], iteration_bounds = array<i64: 2, 1>, scalar_prefetch = 0 : i64, scratch_operands = 2 : i64, tpu.core_type = #tpu.core_type<tc>, window_params = [{transform_indices = @transform_0, window_bounds = array<i64: 1, 4, 16>}, {pipeline_mode = #tpu.pipeline_mode<synchronous>, transform_indices = @transform_1, window_bounds = array<i64: 1, 4, 1>}, {pipeline_mode = #tpu.pipeline_mode<synchronous>, transform_indices = @transform_2, window_bounds = array<i64: 1, 4, 1>}, {transform_indices = @transform_3, window_bounds = array<i64: 1, 4, 16>}]} {
    %c0_i32 = arith.constant 0 : i32
    %0 = arith.cmpi eq, %arg1, %c0_i32 : i32
    %1 = arith.extui %0 : i1 to i32
    %c0_i32_0 = arith.constant 0 : i32
    %2 = arith.cmpi ne, %1, %c0_i32_0 : i32
    scf.if %2 {
      %cst_25 = arith.constant 0.000000e+00 : f32
      %54 = vector.broadcast %cst_25 : f32 to vector<2x1xf32>
      %c0_26 = arith.constant 0 : index
      %c0_27 = arith.constant 0 : index
      %55 = vector.load %arg6[%c0_26, %c0_27] : memref<2x1xf32, #tpu.memory_space<vmem>>, vector<2x1xf32>
      tpu.vector_store %arg6[%c0_26, %c0_27], %54 {strides = array<i32>} : memref<2x1xf32, #tpu.memory_space<vmem>>, vector<2x1xf32>,
    } else {
    }
    %c0 = arith.constant 0 : index
    %c0_1 = arith.constant 0 : index
    %c0_2 = arith.constant 0 : index
    %3 = vector.load %arg2[%c0, %c0_1, %c0_2] : memref<1x4x16xf32, #tpu.memory_space<vmem>>, vector<1x4x16xf32>
    %cst = arith.constant dense<0.000000e+00> : vector<1x16xf32>
    %4 = vector.multi_reduction <add>, %3, %cst [1] : vector<1x4x16xf32> to vector<1x16xf32>
    %5 = arith.mulf %3, %3 : vector<1x4x16xf32>
    %cst_3 = arith.constant dense<0.000000e+00> : vector<1x16xf32>
    %6 = vector.multi_reduction <add>, %5, %cst_3 [1] : vector<1x4x16xf32> to vector<1x16xf32>
    %7 = tpu.concatenate %4, %6 in 0 : vector<1x16xf32>, vector<1x16xf32> -> vector<2x16xf32>
    %8 = tpu.iota {dimensions = array<i32: 0>} : vector<16x16xi32>
    %9 = tpu.iota {dimensions = array<i32: 1>} : vector<16x16xi32>
    %10 = arith.cmpi sle, %8, %9 : vector<16x16xi32>
    %11 = arith.extui %10 : vector<16x16xi1> to vector<16x16xi32>
    %12 = arith.sitofp %11 : vector<16x16xi32> to vector<16x16xf32>
    %c0_4 = arith.constant 0 : index
    %c0_5 = arith.constant 0 : index
    %13 = vector.load %arg6[%c0_4, %c0_5] : memref<2x1xf32, #tpu.memory_space<vmem>>, vector<2x1xf32>
    %cst_6 = arith.constant dense<0.000000e+00> : vector<2x16xf32>
    %14 = tpu.matmul %7, %12, %cst_6 {dimension_numbers = #tpu.dot_dimension_numbers<[1], [0], [0], [1], [0, 0, 1, 1], [], []>, precision = #tpu.contract_precision<fp32>} : vector<2x16xf32>, vector<16x16xf32>, vector<2x16xf32> -> vector<2x16xf32>
    %15 = vector.broadcast %13 : vector<2x1xf32> to vector<2x16xf32>
    %16 = arith.addf %14, %15 : vector<2x16xf32>
    %c0_7 = arith.constant 0 : index
    %c0_8 = arith.constant 0 : index
    %17 = vector.load %arg7[%c0_7, %c0_8] : memref<2x16xf32, #tpu.memory_space<vmem>>, vector<2x16xf32>
    tpu.vector_store %arg7[%c0_7, %c0_8], %16 {strides = array<i32>} : memref<2x16xf32, #tpu.memory_space<vmem>>, vector<2x16xf32>,
    %18 = vector.extract_strided_slice %16 {offsets = [0, 15], sizes = [2, 1], strides = [1, 1]} : vector<2x16xf32> to vector<2x1xf32>
    %c0_9 = arith.constant 0 : index
    %c0_10 = arith.constant 0 : index
    %19 = vector.load %arg6[%c0_9, %c0_10] : memref<2x1xf32, #tpu.memory_space<vmem>>, vector<2x1xf32>
    tpu.vector_store %arg6[%c0_9, %c0_10], %18 {strides = array<i32>} : memref<2x1xf32, #tpu.memory_space<vmem>>, vector<2x1xf32>,
    %c0_11 = arith.constant 0 : index
    %c0_12 = arith.constant 0 : index
    %20 = vector.load %arg7[%c0_11, %c0_12] : memref<2x16xf32, #tpu.memory_space<vmem>>, vector<2x16xf32>
    %21 = tpu.iota {dimensions = array<i32: 1>} : vector<1x16xi32>
    %c16_i32 = arith.constant 16 : i32
    %22 = arith.muli %arg1, %c16_i32 : i32
    %23 = vector.broadcast %22 : i32 to vector<1x16xi32>
    %24 = arith.addi %21, %23 : vector<1x16xi32>
    %c1_i32 = arith.constant 1 : i32
    %25 = vector.broadcast %c1_i32 : i32 to vector<1x16xi32>
    %26 = arith.addi %24, %25 : vector<1x16xi32>
    %27 = arith.sitofp %26 : vector<1x16xi32> to vector<1x16xf32>
    %cst_13 = arith.constant 4.000000e+00 : f32
    %28 = vector.broadcast %cst_13 : f32 to vector<1x16xf32>
    %29 = arith.mulf %27, %28 : vector<1x16xf32>
    %30 = vector.broadcast %29 : vector<1x16xf32> to vector<2x16xf32>
    %31 = arith.divf %20, %30 : vector<2x16xf32>
    %32 = vector.extract_strided_slice %31 {offsets = [0, 0], sizes = [1, 16], strides = [1, 1]} : vector<2x16xf32> to vector<1x16xf32>
    %33 = vector.extract_strided_slice %31 {offsets = [1, 0], sizes = [1, 16], strides = [1, 1]} : vector<2x16xf32> to vector<1x16xf32>
    %34 = arith.mulf %32, %32 : vector<1x16xf32>
    %35 = arith.subf %33, %34 : vector<1x16xf32>
    %cst_14 = arith.constant 0.000000e+00 : f32
    %36 = vector.broadcast %cst_14 : f32 to vector<1x16xf32>
    %37 = arith.maximumf %35, %36 : vector<1x16xf32>
    %cst_15 = arith.constant 9.99999993E-9 : f32
    %38 = vector.broadcast %cst_15 : f32 to vector<1x16xf32>
    %39 = arith.addf %37, %38 : vector<1x16xf32>
    %40 = math.rsqrt %39 : vector<1x16xf32>
    %c0_16 = arith.constant 0 : index
    %c0_17 = arith.constant 0 : index
    %c0_18 = arith.constant 0 : index
    %41 = vector.load %arg3[%c0_16, %c0_17, %c0_18] : memref<1x4x1xf32, #tpu.memory_space<vmem>>, vector<1x4x1xf32>
    %c0_19 = arith.constant 0 : index
    %c0_20 = arith.constant 0 : index
    %c0_21 = arith.constant 0 : index
    %42 = vector.load %arg4[%c0_19, %c0_20, %c0_21] : memref<1x4x1xf32, #tpu.memory_space<vmem>>, vector<1x4x1xf32>
    %43 = vector.shape_cast %32 : vector<1x16xf32> to vector<1x1x16xf32>
    %44 = vector.broadcast %43 : vector<1x1x16xf32> to vector<1x4x16xf32>
    %45 = arith.subf %3, %44 : vector<1x4x16xf32>
    %46 = vector.shape_cast %40 : vector<1x16xf32> to vector<1x1x16xf32>
    %47 = vector.broadcast %46 : vector<1x1x16xf32> to vector<1x4x16xf32>
    %48 = arith.mulf %45, %47 : vector<1x4x16xf32>
    %49 = vector.broadcast %41 : vector<1x4x1xf32> to vector<1x4x16xf32>
    %50 = arith.mulf %48, %49 : vector<1x4x16xf32>
    %51 = vector.broadcast %42 : vector<1x4x1xf32> to vector<1x4x16xf32>
    %52 = arith.addf %50, %51 : vector<1x4x16xf32>
    %c0_22 = arith.constant 0 : index
    %c0_23 = arith.constant 0 : index
    %c0_24 = arith.constant 0 : index
    %53 = vector.load %arg5[%c0_22, %c0_23, %c0_24] : memref<1x4x16xf32, #tpu.memory_space<vmem>>, vector<1x4x16xf32>
    tpu.vector_store %arg5[%c0_22, %c0_23, %c0_24], %52 {strides = array<i32>} : memref<1x4x16xf32, #tpu.memory_space<vmem>>, vector<1x4x16xf32>,
    return
  }
  func.func @transform_0(%arg0: i32, %arg1: i32) -> (i32, i32, i32) {
    %c0_i32 = arith.constant 0 : i32
    %c0_i32_0 = arith.constant 0 : i32
    return %arg0, %c0_i32, %arg1 : i32, i32, i32
  }
  func.func @transform_1(%arg0: i32, %arg1: i32) -> (i32, i32, i32) {
    %c0_i32 = arith.constant 0 : i32
    %c0_i32_0 = arith.constant 0 : i32
    %c0_i32_1 = arith.constant 0 : i32
    %c0_i32_2 = arith.constant 0 : i32
    return %c0_i32, %c0_i32_0, %c0_i32_1 : i32, i32, i32
  }
  func.func @transform_2(%arg0: i32, %arg1: i32) -> (i32, i32, i32) {
    %c0_i32 = arith.constant 0 : i32
    %c0_i32_0 = arith.constant 0 : i32
    %c0_i32_1 = arith.constant 0 : i32
    %c0_i32_2 = arith.constant 0 : i32
    return %c0_i32, %c0_i32_0, %c0_i32_1 : i32, i32, i32
  }
  func.func @transform_3(%arg0: i32, %arg1: i32) -> (i32, i32, i32) {
    %c0_i32 = arith.constant 0 : i32
    %c0_i32_0 = arith.constant 0 : i32
    return %arg0, %c0_i32, %arg1 : i32, i32, i32
  }
}

</mosaic_0001>

<bundles_post_ra>
// kernel: tpu_custom_call.1
= control target key start
LH: loop header
LB: loop body
LE: loop exit
PB: predicated region body
PF: predicated region fallthrough
CT: control target
= control target key end

     0   :  { %8 = vsyncpa [#allocation5], 0  ;;  %s1294_s0 = inlined_call_operand.vmem [shape: f32[2,4,16], index: 0, kind: input, shape index: {}]   ;;  %s1295_s1 = inlined_call_operand.vmem [shape: f32[1,4,1], index: 1, kind: input, shape index: {}]   ;;  %s1296_s2 = inlined_call_operand.vmem [shape: f32[1,4,1], index: 2, kind: input, shape index: {}]   ;;  %s1297_s3 = inlined_call_operand.hbm [shape: f32[2,4,16], index: 3, kind: output, shape index: {}]  }
   0x1   :  { %10 = vsyncpa [#allocation5 + $0x1], 0  ;;  %s1113_s12 = smov 0   ;;  %s1115_s13 = smov 0  }
   0x2   :  { %s1117_s14 = smov 0   ;;  %s1119_s15 = smov 0  }
   0x3   :  { %s1121_s16 = smov 0   ;;  %s1123_s17 = smov 0  }
   0x4 LB: > { %s832_s18 = sadd.s32 4294967295, %s1084_s17   ;;  %s833_s19 = sadd.s32 4294967294, %s1084_s17   ;;  %s1084_s17 = sphi %s1123_s17, %s16_s17   ;;  %s1080_s16 = sphi %s1121_s16, %s1306_s16   ;;  %s1076_s15 = sphi %s1119_s15, %s1305_s15   ;;  %s1072_s14 = sphi %s1117_s14, %s1304_s14   ;;  %s1068_s13 = sphi %s1115_s13, %s1303_s13   ;;  %s1064_s12 = sphi %s1113_s12, %s1302_s12  }
   0x5   : > { %s28_s20 = sadd.s32 1, %s1080_s16  ;;  %s107_s21 = sadd.s32 1, %s1072_s14 }
   0x6   : > { %p30_p0 = scmp.ge.s32.totalorder %s28_s20, 2  ;;  %p117_p1 = scmp.ne.s32.totalorder %s1072_s14, %s1068_s13 }
   0x7   : > { %p118_p2 = scmp.eq.s32.totalorder %s832_s18, 1  ;;  %p123_p3 = scmp.ne.s32.totalorder %s1068_s13, %s1064_s12 }
   0x8   : > { %s1308_s20 = smov (%p30_p0, %s28_s20), 0  ;;  %p124_p5 = scmp.eq.s32.totalorder %s833_s19, 1 }
   0x9   : > { %p1153_p4 = por %p118_p2, %p117_p1  ;;  %s102_s23 = ssub.s32 %s1080_s16, %s1308_s20 }
   0xa   : > { %p836_p6 = scmp.ge.s32.totalorder %s1084_s17, 1  ;;  %p105_p7 = scmp.eq.s32.totalorder %s102_s23, 0 }
   0xb   : > { %p1160_p8 = por %p124_p5, %p123_p3  ;;  %p158_p9 = scmp.lt.s32.totalorder %s1084_s17, 3 }
   0xc   : > { %s1166_s25 = scalar_select %p105_p7, %s1072_s14, %s107_s21  }
   0xd   : > { %p159_p10 = pnand %p836_p6, %p158_p9 }
   0xe   : > { %v216_v0 = vlaneseq (!%p159_p10)  ;;  %p184_p11 = scmp.lt.s32.totalorder (!%p159_p10), %s1076_s15, 1  ;;  %v1086_v1 = vmov (!%p159_p10), 0.0|0.0   ;;  %vm1087_vm0 = vmmov (!%p159_p10), 0   ;;  %v1088_v4 = vmov (!%p159_p10), 0.0   ;;  %v722_v6 = vld [vmem:[%s1296_s2] sm:$0xf] (!%p159_p10) }
   0xf   : > { %162 = sbr.rel (%p159_p10) target bundleno = 402 (0x192), region = 32  ;;  %920 = vmatprep.subr.bf16.mxu0 (!%p159_p10), %v1086_v1  ;;  %911 = vmatprep.subr.bf16.mxu1 (!%p159_p10), %v1086_v1  ;;  %vm195_vm1 = vcmask (!%p159_p10), 1024   ;;  %v1089_v5 = vmov (!%p159_p10), 0   ;;  %vm198_vm3 = vcmask (!%p159_p10), 125952   ;;  %v1090_v12 = vmov (!%p159_p10), 1.0|1.0  }
  0x10   : > { %v1171_v2 = vshrl.u32 (!%p159_p10), %v216_v0, 7  ;;  %v1173_v3 = vand.u32 (!%p159_p10), 127, %v216_v0  ;;  %894 = vmatprep.mubr.msk.f32.mxu0 (!%p159_p10), %vm1087_vm0, %v1088_v4  ;;  %873 = vmatprep.mubr.msk.f32.mxu1 (!%p159_p10), %vm1087_vm0, %v1088_v4  ;;  %196 = vst.msk [vmem:[#allocation2] sm:$0x3] (!%p159_p10), %vm195_vm1, %v1088_v4  ;;  %v721_v19 = vld [vmem:[%s1295_s1] sm:$0xf] (!%p159_p10) }
  0x11   : > { %1000 = vset.pattern.permute.xlu0 (!%p159_p10), %v1089_v5  ;;  %1001 = vset.pattern.permute.xlu1 (!%p159_p10), %v1089_v5  ;;  %vm214_vm6 = vcmask (!%p159_p10), 1040384   ;;  %vm233_vm7 = vcmask (!%p159_p10), 130048   ;;  %vm696_vm8 = vcmask (!%p159_p10), 123904   ;;  %s1091_s8 = smov (!%p159_p10), 113   ;;  %s181_s9 = sand.u32 (!%p159_p10), 1, %s1068_s13  }
  0x12   : > { %v218_v7 = vadd.s32 (!%p159_p10), 8, %v1171_v2  ;;  %vm221_vm2 = vcmp.le.s32.totalorder (!%p159_p10), %v1171_v2, %v1173_v3  ;;  %741 = vperm.xlu1 (!%p159_p10), %1001, %v722_v6   ;;  %v708_v48 = vadd.s32 (!%p159_p10), 1, %v1173_v3  ;;  %v730_v5 = vsub.s32 (!%p159_p10), 1, %v1171_v2  ;;  %s837_s10 = sshll.u32 (!%p159_p10), %s181_s9, 2  ;;  %s848_s11 = sshll.u32 (!%p159_p10), %s1076_s15, 6 }
  0x13   : > { %v839_v20 = vsel (!%p159_p10), %vm221_vm2, 1.0, %v1088_v4  ;;  %s183_s18 = scalar_lea.vmem (!%p159_p10), [#allocation4], %s837_s10  ;;  %s747_s27 = scalar_lea.sflag (!%p159_p10), [#allocation5], %s181_s9 }
  0x14   : > { %vm222_vm4 = vcmp.le.s32.totalorder (!%p159_p10), %v218_v7, %v1173_v3  ;;  %v316_v25 = vsub.f32 (!%p159_p10), %v839_v20, %v839_v20  ;;  %v709_v49 = vcvt.s32.f32 (!%p159_p10), %v708_v48  ;;  %v725_v3 = vsub.s32 (!%p159_p10), 0, %v1171_v2  ;;  %s761_s19 = sshll.u32 (!%p159_p10), %s183_s18, 4  ;;  %s1247_s19 = int_to_ptr.vmem [resolvable:$true] %s761_s19 }
  0x15   : > { %vm1199_vm5 = vmpackc.low (!%p159_p10), %vm222_vm4, %vm221_vm2  ;;  %v840_v21 = vsel (!%p159_p10), %vm222_vm4, 1.0, %v1088_v4  ;;  %s1006_s28 = scalar_lea.vmem (!%p159_p10), %s1247_s19, 64 }
  0x16   : > { %s185_s26 = scalar_select %p184_p11, %s1076_s15, 1  ;;  %922 = vmatpush3.bf16.msk.msra.mxu0 %vm1199_vm5, %v1090_v12  ;;  %913 = vmatpush3.bf16.msk.msra.mxu1 %vm1199_vm5, %v1090_v12  ;;  %v323_v26 = vsub.f32 %v840_v21, %v840_v21  ;;  %v317_v31 = vand.u32 4294901760, %v316_v25  ;;  %v710_v50 = vmul.f32 4.0, %v709_v49 }
  0x17   : > { %914 = vmatprep.subr.bf16.mxu1 %v1086_v1  ;;  %923 = vmatprep.subr.bf16.mxu0 %v1086_v1  ;;  %v227_v16 = vld [vmem:[#allocation2] sm:$0x3]  ;;  %p1007_p12 = scmp.ne.s32.totalorder %s1247_s19, %s1006_s28  ;;  %s1092_s15 = smov [#allocation4]  }
  0x18   : > { %s838_s29 = sshll.u32 %s185_s26, 2  ;;  %230 = vperm.xlu0 %1000, %v227_v16   ;;  %v324_v32 = vand.u32 4294901760, %v323_v26  ;;  %v318_v35 = vsub.f32 %v316_v25, %v317_v31  ;;  %v918_v47 = vpack.c.bf16 %v323_v26, %v316_v25  ;;  %1002 = vrcp.f32 %v710_v50  ;;  %s1245_s26 = scalar_lea.hbm %s1297_s3, %s848_s11 }
  0x19   : > { %s190_s5 = scalar_lea.vmem %s1294_s0, %s838_s29  ;;  %p1008_p13 = pnand %p1007_p12, %p1153_p4 }
  0x1a   : > { %v1192_v8 = vld [vmem:[%s190_s5] sm:$0xf]  ;;  %v325_v36 = vsub.f32 %v323_v26, %v324_v32  ;;  %v319_v40 = vand.u32 4294901760, %v318_v35  ;;  %v924_v42 = vpack.c.bf16 %v324_v32, %v317_v31  ;;  %s1010_s29 = sshll.u32 %s1092_s15, 4  ;;  %s1011_s29 = int_to_ptr.vmem [resolvable:$false] %s1010_s29 }
  0x1b   : > { %v199_v10 = vsel %vm198_vm3, %v1192_v8, 0.0  ;;  %v206_v11 = vmul.f32 %v1192_v8, %v1192_v8  ;;  %p1009_p0 = pneg %p1008_p13  ;;  %s1012_s30 = scalar_lea.vmem %s1011_s29, 128 }
  0x1c   : > { %v200_v13 = vrot.slane %v199_v10, 4  ;;  %735 = vperm.xlu0 %1000, %v721_v19   ;;  %v326_v41 = vand.u32 4294901760, %v325_v36  ;;  %p1013_p1 = scmp.lt.s32.totalorder %s1247_s19, %s1011_s29  ;;  %p1014_p2 = scmp.lt.s32.totalorder %s1012_s30, %s1006_s28 }
  0x1d   : > { %v207_v14 = vsel %vm198_vm3, %v206_v11, 0.0 }
  0x1e   : > { %v201_v15 = vadd.f32 %v200_v13, %v199_v10  ;;  %v208_v17 = vrot.slane %v207_v14, 4  ;;  %v915_v45 = vpack.c.bf16 %v326_v41, %v319_v40  ;;  %p1015_p3 = por %p1014_p2, %p1013_p1 }
  0x20   : > { %v202_v18 = vrot.slane %v201_v15, 2  ;;  %v209_v22 = vadd.f32 %v208_v17, %v207_v14  ;;  %p1016_p5 = pnand %p1015_p3, %p1009_p0 }
  0x22   : > { %v203_v23 = vadd.f32 %v202_v18, %v201_v15  ;;  %v210_v24 = vrot.slane %v209_v22, 2  ;;  %v1003_v58 = vpop.eup %1002 }
  0x24   : > { %v204_v27 = vrot.slane %v203_v23, 1  ;;  %v211_v28 = vadd.f32 %v210_v24, %v209_v22 }
  0x26   : > { %v205_v29 = vadd.f32 %v204_v27, %v203_v23  ;;  %v212_v30 = vrot.slane %v211_v28, 1 }
  0x28   : > { %v213_v33 = vadd.f32 %v212_v30, %v211_v28 }
  0x2a   : > { %v215_v34 = vsel %vm214_vm6, %v205_v29, %v213_v33 }
  0x2b   : > { %v235_v37 = vsel %vm233_vm7, %v215_v34, 0 }
  0x2c   : > { %v304_v38 = vand.u32 4294901760, %v235_v37 }
  0x2e   : > { %v305_v39 = vsub.f32 %v235_v37, %v304_v38 }
  0x30   : > { %v306_v43 = vand.u32 4294901760, %v305_v39 }
  0x32   : > { %895 = vmatmul.mubr.f32.vlgmr.msra.gmra.mrb[0].mxu0 %v306_v43  ;;  %v307_v44 = vsub.f32 %v305_v39, %v306_v43 }
  0x33   : > { %925 = vmatpush3.bf16.msra.mxu0 %v924_v42  ;;  %901 = vmatprep.mubr.msk.f32.mxu0 %vm1087_vm0, %v1088_v4 }
  0x34   : > { %v308_v46 = vand.u32 4294901760, %v307_v44  ;;  %926 = vmatprep.subr.bf16.mxu0 %v1086_v1 }
  0x36   : > { %874 = vmatmul.mubr.f32.vlgmr.msra.gmra.mrb[0].mxu1 %v308_v46 }
  0x37   : > { %916 = vmatpush3.bf16.msra.mxu1 %v915_v45  ;;  %880 = vmatprep.mubr.msk.f32.mxu1 %vm1087_vm0, %v1088_v4 }
  0x38   : > { %917 = vmatprep.subr.bf16.mxu1 %v1086_v1 }
  0x3a   : > { %902 = vmatmul.mubr.f32.vlgmr.msra.gmra.mrb[0].mxu0 %v304_v38 }
  0x3b   : > { %928 = vmatpush3.bf16.msk.msra.mxu0 %vm1199_vm5, %v1090_v12  ;;  %908 = vmatprep.mubr.msk.f32.mxu0 %vm1087_vm0, %v1088_v4 }
  0x3e   : > { %881 = vmatmul.mubr.f32.vlgmr.msra.gmra.mrb[0].mxu1 %v304_v38 }
  0x3f   : > { %919 = vmatpush3.bf16.msra.mxu1 %v918_v47  ;;  %887 = vmatprep.mubr.msk.f32.mxu1 %vm1087_vm0, %v1088_v4 }
  0x42   : > { %909 = vmatmul.mubr.f32.vlgmr.msra.gmra.mrb[0].mxu0 %v304_v38 }
  0x46   : > { %888 = vmatmul.mubr.f32.vlgmr.msra.gmra.mrb[0].mxu1 %v305_v39 }
  0x91   : > { %v742_v12 = vpop.permute.xlu1 %741 }
  0x97   : > { %v231_v53 = vpop.permute.xlu0 %230 }
  0x9b   : > { %v736_v11 = vpop.permute.xlu0 %735 }
 0x115   : > { %v692_v51 = vpop.f32.mrb[0].mxu0 }
 0x116   : > { %v910_v52 = vpop.f32.mrb[1].mxu0 }
 0x119   : > { %v467_v54 = vpop.f32.mrb[0].mxu1 }
 0x11a   : > { %v929_v55 = vadd.f32 %v467_v54, %v231_v53  ;;  %v889_v56 = vpop.f32.mrb[1].mxu1 }
 0x11c   : > { %v930_v57 = vadd.f32 %v929_v55, %v692_v51 }
 0x11e   : > { %697 = vst.msk [vmem:[#allocation3] sm:$0x3] %vm696_vm8, %v930_v57  ;;  %699 = vrot.lane.b32.xlu1 %v930_v57, %s1091_s8 }
 0x125   : > { %v704_v59 = vld [vmem:[#allocation3] sm:$0x3] }
 0x126   : > { %v712_v60 = vmul.f32 %v1003_v58, %v704_v59 }
 0x128   : > { %v713_v61 = vmul.f32 %v712_v60, %v712_v60  ;;  %v726_v4 = vrot.slane %v712_v60, %v725_v3 }
 0x12a   : > { %v715_v62 = vrot.slane %v713_v61, 7  ;;  %v727_v7 = vsub.f32 %v1192_v8, %v726_v4 }
 0x12c   : > { %v717_v63 = vsub.f32 %v712_v60, %v715_v62 }
 0x12e   : > { %v718_v0 = vmax.f32 %v717_v63, 0.0 }
 0x130   : > { %v719_v1 = vadd.f32 1e-08, %v718_v0 }
 0x132   : > { %1004 = vrsqrt.f32 %v719_v1 }
 0x13c   : > { %v1005_v6 = vpop.eup %1004 }
 0x13d   : > { %v731_v9 = vrot.slane %v1005_v6, %v730_v5 }
 0x13f   : > { %v732_v10 = vmul.f32 %v731_v9, %v727_v7 }
 0x141   : > { %v738_v13 = vmul.f32 %v736_v11, %v732_v10 }
 0x143   : > { %v744_v14 = vadd.f32 %v742_v12, %v738_v13 }
 0x145   : > { %745 = vst.msk [vmem:[%s183_s18] sm:$0xf] %vm198_vm3, %v744_v14 }
 0x146   : > { %1019 = shalt.err (!%p1016_p5)
}
 0x147   : > { %s1020_s4 = scalar_lea.hbm %s1245_s26, 64  ;;  %s1024_s7 = scalar_lea.hbm %s1297_s3, 128 }
 0x148   : > { %p1021_p6 = scmp.ne.s32.totalorder %s1245_s26, %s1020_s4  ;;  %p1025_p10 = scmp.lt.u32.totalorder %s1245_s26, %s1297_s3 }
 0x149   : > { %p1026_p11 = scmp.lt.u32.totalorder %s1024_s7, %s1020_s4  ;;  %p1028_p13 = scmp.lt.u32.totalorder %s1020_s4, %s1245_s26 }
 0x14a   : > { %p1022_p7 = pnand %p1021_p6, %p1153_p4 }
 0x14b   : > { %p1027_p12 = por %p1026_p11, %p1025_p10 }
 0x14c   : > { %p1023_p9 = pneg %p1022_p7 }
 0x14d   : > { %p1029_p0 = por %p1028_p13, %p1027_p12 }
 0x14f   : > { %p1030_p1 = pnand %p1029_p0, %p1023_p9 }
 0x151   : > { %1033 = shalt.err (!%p1030_p1)
}
 0x152   : > { %939 = dma.vmem_to_hbm [thread:$0]  (%p1153_p4), %s1247_s19, 64, %s1245_s26, %s747_s27  }
 0x190   : > { %v700_v2 = vpop.permute.xlu1 %699 }
 0x191   : > { %703 = vst.msk [vmem:[#allocation2] sm:$0x3] %vm195_vm1, %v700_v2 }
 0x192 PF: > { %p945_p2 = scmp.ge.s32.totalorder %s1084_s17, 2  ;;  %s773_s10 = sand.u32 1, %s1064_s12  }
 0x193   : > { %s774_s11 = scalar_lea.sflag [#allocation5], %s773_s10 }
 0x194   : > { %p942_p3 = pnand %p945_p2, %p1160_p8 }
 0x196   : > { %1059 = dma.done.wait (!%p942_p3), %s774_s11, 64  }
 0x197   : > { %1061 = vsyncadd (!%p942_p3), %s774_s11, 4294967232  ;;  %s16_s17 = sadd.s32 1, %s1084_s17   ;;  %s1302_s12 = smov %s1068_s13 }
 0x198   : > { %p13_p5 = scmp.ge.s32.totalorder %s16_s17, 4   ;;  %s1303_s13 = smov %s1072_s14 }
 0x199   : > { %s1304_s14 = smov %s1166_s25  ;;  %s1305_s15 = smov %s1080_s16 }
 0x19a   : > { %s1306_s16 = smov %s1308_s20  ;;  %15 = sbr.rel (!%p13_p5) target bundleno = 4 (0x4), region = 71 }
 0x1a1   :  { %779 = vsyncpa [#allocation5], 1 }
 0x1a2   :  { %781 = vsyncpa [#allocation5 + $0x1], 1 }

</bundles_post_ra>
